<compile_context>
chip_gen: v5e
topology: v5e:2x2
jax: 0.10.0
libtpu: 0.0.40
codegen_flags: <defaults>
</compile_context>

<pallas_src>
import jax
import jax.numpy as jnp
from jax.experimental import pallas as pl
from jax.experimental.pallas import tpu as pltpu


def _cdiv(a, b):
    return -(-a // b)


def _round_up(x, m):
    return _cdiv(x, m) * m


def _lane_dense(x, preferred_lane=512):
    """Flatten a tensor to (rows, L) with L a multiple of 128 (lane-dense).

    Only the sum of squares is needed, so the 2D shape is arbitrary.  Prefer an
    exact-dividing width (no copy); otherwise zero-pad the flat tail (zeros do not
    change the sum of squares).
    """
    flat = x.reshape(-1)
    n = int(flat.shape[0])
    for cand in (max(preferred_lane, 128), 512, 384, 256, 128):
        if cand % 128 == 0 and n >= cand and n % cand == 0:
            return flat.reshape(n // cand, cand)
    lane = preferred_lane if n >= preferred_lane else _round_up(max(n, 1), 128)
    lane = _round_up(lane, 128)
    pad = _round_up(n, lane) - n
    if pad:
        flat = jnp.pad(flat, (0, pad))
    return flat.reshape(-1, lane)


def _rows_per_tile(total_rows, last_dim, itemsize, max_rows, budget_bytes):
    """Largest multiple-of-8 row count whose LANE-PADDED tile fits the budget."""
    row_bytes = _round_up(max(last_dim, 1), 128) * max(itemsize, 1)
    r = max(8, min(max_rows, budget_bytes // row_bytes))
    r = max(8, (r // 8) * 8)
    return min(r, _round_up(max(total_rows, 1), 8))


def _padded_tile_bytes(rows, cols, itemsize):
    return _round_up(max(rows, 1), 8) * _round_up(max(cols, 1), 128) * max(itemsize, 1)


def _hw_vmem_cap_bytes():
    """Generation-aware VMEM request ceiling (conservative fallback)."""
    try:
        info = pltpu.get_tpu_info()
        cap = getattr(info, "vmem_capacity_bytes", None)
        if cap:
            # Leave headroom for compiler-internal scratch; never ask for >100 MiB.
            return int(max(32 << 20, min(int(cap) - (16 << 20), 100 << 20)))
    except Exception:
        pass
    return 48 << 20  # safe on every generation, including 64-MiB-VMEM parts (v7x)


def combine_loss(pred_logits, targets, attn_weights1, attn_weights2, per_cls_weights,
                 *, max_tile_rows=4096, tile_budget_bytes=4 * 1024 * 1024):
    B, C = pred_logits.shape
    targets_2d = targets.astype(jnp.int32).reshape(B, 1)
    w_2d = jnp.asarray(per_cls_weights, dtype=jnp.float32).reshape(1, C)
    a1 = _lane_dense(attn_weights1)
    a2 = _lane_dense(attn_weights2)
    R1, L1 = a1.shape
    R2, L2 = a2.shape

    bytes_l = jnp.dtype(pred_logits.dtype).itemsize
    bytes_1 = jnp.dtype(a1.dtype).itemsize
    bytes_2 = jnp.dtype(a2.dtype).itemsize

    # Independent per-operand tile heights (kept at their caps, not coupled to NT).
    TB = _rows_per_tile(B, C, bytes_l, max_tile_rows, tile_budget_bytes)
    RT1 = _rows_per_tile(R1, L1, bytes_1, max_tile_rows, tile_budget_bytes)
    RT2 = _rows_per_tile(R2, L2, bytes_2, max_tile_rows, tile_budget_bytes)

    nb_l = _cdiv(B, TB)      # real logits/targets blocks
    nb_1 = _cdiv(R1, RT1)    # real attn1 blocks
    nb_2 = _cdiv(R2, RT2)    # real attn2 blocks
    NT = max(nb_l, nb_1, nb_2, 1)

    inv_b = 1.0 / float(B)

    def kernel(logits_ref, tgt_ref, w_ref, a1_ref, a2_ref, out_ref,
               acc_ce, acc_s1, acc_s2):
        i = pl.program_id(0)

        @pl.when(i == 0)
        def _init():
            acc_ce[...] = jnp.zeros_like(acc_ce)
            acc_s1[...] = jnp.zeros_like(acc_s1)
            acc_s2[...] = jnp.zeros_like(acc_s2)

        # ---- weighted cross-entropy partial sums (per-class accumulator) ----
        @pl.when(i < nb_l)
        def _ce():
            logits = logits_ref[...].astype(jnp.float32)              # (TB, C)
            tgt = tgt_ref[...]                                        # (TB, 1) int32
            w = w_ref[...].astype(jnp.float32)                        # (1, C)

            class_ids = jax.lax.broadcasted_iota(jnp.int32, (TB, C), 1)
            row_ids = i * TB + jax.lax.broadcasted_iota(jnp.int32, (TB, 1), 0)

            row_max = jnp.max(logits, axis=-1, keepdims=True)
            lse = jnp.log(jnp.sum(jnp.exp(logits - row_max), axis=-1,
                                  keepdims=True)) + row_max           # (TB, 1)

            # One-hot masked contribution; ragged/OOB rows masked BEFORE any reduce,
            # so garbage (inf/NaN) in discarded rows never reaches the accumulator.
            hit = (class_ids == tgt) & (row_ids < B)                  # (TB, C)
            contrib = jnp.where(hit, (lse - logits) * w, 0.0)         # (TB, C)
            acc_ce[...] += jnp.sum(contrib, axis=0, keepdims=True)    # sublane reduce

        # ---- sum-of-squares partial sums for the two attention tensors ----
        def _ssq_update(a_ref, acc, rt, total_rows):
            a = a_ref[...].astype(jnp.float32)                        # (rt, L)
            rids = i * rt + jax.lax.broadcasted_iota(jnp.int32, (rt, 1), 0)
            sq = jnp.where(rids < total_rows, a * a, 0.0)
            acc[...] += jnp.sum(sq, axis=0, keepdims=True)            # sublane reduce

        @pl.when(i < nb_1)
        def _s1():
            _ssq_update(a1_ref, acc_s1, RT1, R1)

        @pl.when(i < nb_2)
        def _s2():
            _ssq_update(a2_ref, acc_s2, RT2, R2)

        # ---- finalize exactly once: cross-lane reduces, sqrt, 0.01 scale, 1/B ----
        @pl.when(i == pl.num_programs(0) - 1)
        def _finalize():
            ce = jnp.sum(acc_ce[...], axis=1, keepdims=True)          # (1, 1)
            s1 = jnp.sum(acc_s1[...], axis=1, keepdims=True)
            s2 = jnp.sum(acc_s2[...], axis=1, keepdims=True)
            reg = jnp.float32(0.01) * (jnp.sqrt(s1) + jnp.sqrt(s2))
            out_ref[...] = (ce + reg) * jnp.float32(inv_b)

    # --- VMEM request: double-buffered lane-padded input tiles + f32 temporaries ---
    in_tiles = (_padded_tile_bytes(TB, C, bytes_l)
                + _padded_tile_bytes(TB, 1, 4)
                + _padded_tile_bytes(1, C, 4)
                + _padded_tile_bytes(RT1, L1, bytes_1)
                + _padded_tile_bytes(RT2, L2, bytes_2))
    f32_tmp = (3 * _padded_tile_bytes(TB, C, 4)
               + _padded_tile_bytes(RT1, L1, 4)
               + _padded_tile_bytes(RT2, L2, 4))
    acc_bytes = (_padded_tile_bytes(1, C, 4)
                 + _padded_tile_bytes(1, L1, 4)
                 + _padded_tile_bytes(1, L2, 4))
    vmem_needed = 2 * in_tiles + f32_tmp + acc_bytes + (4 << 20)
    vmem_limit = int(min(max(vmem_needed, 32 << 20), _hw_vmem_cap_bytes()))

    out = pl.pallas_call(
        kernel,
        out_shape=jax.ShapeDtypeStruct((1, 1), jnp.float32),
        grid=(NT,),
        in_specs=[
            # Clamped block indices: exhausted streams keep presenting their last block
            # (no re-DMA since the index doesn't change) while compute is @pl.when-gated.
            pl.BlockSpec((TB, C), lambda i: (jnp.minimum(i, nb_l - 1), 0)),    # logits
            pl.BlockSpec((TB, 1), lambda i: (jnp.minimum(i, nb_l - 1), 0)),    # targets
            pl.BlockSpec((1, C), lambda i: (0, 0)),                            # class w
            pl.BlockSpec((RT1, L1), lambda i: (jnp.minimum(i, nb_1 - 1), 0)),  # attn1
            pl.BlockSpec((RT2, L2), lambda i: (jnp.minimum(i, nb_2 - 1), 0)),  # attn2
        ],
        out_specs=pl.BlockSpec((1, 1), lambda i: (0, 0)),
        scratch_shapes=[
            pltpu.VMEM((1, C), jnp.float32),    # per-class CE accumulator
            pltpu.VMEM((1, L1), jnp.float32),   # per-lane sum(attn1^2)
            pltpu.VMEM((1, L2), jnp.float32),   # per-lane sum(attn2^2)
        ],
        compiler_params=pltpu.CompilerParams(
            dimension_semantics=("arbitrary",),
            vmem_limit_bytes=vmem_limit),
    )(pred_logits, targets_2d, w_2d, a1, a2)
    return out[0, 0]


def combine_loss_ref(pred_logits, targets, attn_weights1, attn_weights2, per_cls_weights):
    """Pure-JAX reference mirroring the PyTorch CombineLoss module."""
    logits = pred_logits.astype(jnp.float32)
    w = jnp.asarray(per_cls_weights, dtype=jnp.float32)
    logp = jax.nn.log_softmax(logits, axis=-1)
    B = logits.shape[0]
    nll = -logp[jnp.arange(B), targets] * w[targets]
    reg = 0.01 * (jnp.sqrt(jnp.sum(attn_weights1.astype(jnp.float32) ** 2))
                  + jnp.sqrt(jnp.sum(attn_weights2.astype(jnp.float32) ** 2)))
    return (jnp.sum(nll) + reg) / B


if __name__ == "__main__":
    key = jax.random.PRNGKey(0)
    ks = jax.random.split(key, 10)

    # Case 1: small VPT-like shapes (single grid step).
    B, C = 8, 16
    logits = jax.random.normal(ks[0], (B, C), dtype=jnp.float32)
    targets = jax.random.randint(ks[1], (B,), 0, C, dtype=jnp.int32)
    attn1 = jax.random.normal(ks[2], (B, 4, 8, 8), dtype=jnp.float32)
    attn2 = jax.random.normal(ks[3], (B, 4, 8, 8), dtype=jnp.float32)
    per_cls_weights = 0.5 + jax.random.uniform(ks[4], (C,), dtype=jnp.float32)

    out1 = jax.block_until_ready(
        combine_loss(logits, targets, attn1, attn2, per_cls_weights))
    ref1 = combine_loss_ref(logits, targets, attn1, attn2, per_cls_weights)
    assert jnp.allclose(out1, ref1, rtol=1e-5, atol=1e-5), (out1, ref1)

    # Case 2: tiny max_tile_rows forces a multi-step grid -> exercises decoupled tile
    # heights, @pl.when stream gating, clamped index maps, ragged-row masking, and the
    # lane-dense flatten (384-wide exact split + 128-wide zero-padded tail).
    B2, C2 = 26, 40
    logits2 = jax.random.normal(ks[5], (B2, C2), dtype=jnp.float32)
    targets2 = jax.random.randint(ks[6], (B2,), 0, C2, dtype=jnp.int32)
    attn1b = jax.random.normal(ks[7], (B2, 3, 8, 8), dtype=jnp.float32)
    attn2b = jax.random.normal(ks[8], (5, 16), dtype=jnp.float32)
    per_cls_weights2 = 0.5 + jax.random.uniform(ks[9], (C2,), dtype=jnp.float32)

    out2 = jax.block_until_ready(
        combine_loss(logits2, targets2, attn1b, attn2b, per_cls_weights2,
                     max_tile_rows=8))
    ref2 = combine_loss_ref(logits2, targets2, attn1b, attn2b, per_cls_weights2)
    assert jnp.allclose(out2, ref2, rtol=1e-5, atol=1e-5), (out2, ref2)

    print("KERNEL_OK")
</pallas_src>

<mosaic_0001>
module attributes {stable_mosaic.version = 11 : i64} {
  func.func @kernel(%arg0: i32, %arg1: memref<8x16xf32, #tpu.memory_space<vmem>>, %arg2: memref<8x1xi32, #tpu.memory_space<vmem>>, %arg3: memref<1x16xf32, #tpu.memory_space<vmem>>, %arg4: memref<8x512xf32, #tpu.memory_space<vmem>>, %arg5: memref<8x512xf32, #tpu.memory_space<vmem>>, %arg6: memref<1x1xf32, #tpu.memory_space<vmem>>, %arg7: memref<1x16xf32, #tpu.memory_space<vmem>>, %arg8: memref<1x512xf32, #tpu.memory_space<vmem>>, %arg9: memref<1x512xf32, #tpu.memory_space<vmem>>) attributes {dimension_semantics = [#tpu.dimension_semantics<arbitrary>], iteration_bounds = array<i64: 1>, scalar_prefetch = 0 : i64, scratch_operands = 3 : i64, tpu.core_type = #tpu.core_type<tc>, window_params = [{transform_indices = @transform_0, window_bounds = array<i64: 8, 16>}, {transform_indices = @transform_1, window_bounds = array<i64: 8, 1>}, {pipeline_mode = #tpu.pipeline_mode<synchronous>, transform_indices = @transform_2, window_bounds = array<i64: 1, 16>}, {transform_indices = @transform_3, window_bounds = array<i64: 8, 512>}, {transform_indices = @transform_4, window_bounds = array<i64: 8, 512>}, {pipeline_mode = #tpu.pipeline_mode<synchronous>, transform_indices = @transform_5, window_bounds = array<i64: 1, 1>}]} {
    %c0_i32 = arith.constant 0 : i32
    %0 = arith.cmpi eq, %arg0, %c0_i32 : i32
    %1 = arith.extui %0 : i1 to i32
    %c0_i32_0 = arith.constant 0 : i32
    %2 = arith.cmpi ne, %1, %c0_i32_0 : i32
    scf.if %2 {
      %cst = arith.constant 0.000000e+00 : f32
      %15 = vector.broadcast %cst : f32 to vector<1x16xf32>
      %c0 = arith.constant 0 : index
      %c0_8 = arith.constant 0 : index
      %16 = vector.load %arg7[%c0, %c0_8] : memref<1x16xf32, #tpu.memory_space<vmem>>, vector<1x16xf32>
      tpu.vector_store %arg7[%c0, %c0_8], %15 {strides = array<i32>} : memref<1x16xf32, #tpu.memory_space<vmem>>, vector<1x16xf32>,
      %cst_9 = arith.constant 0.000000e+00 : f32
      %17 = vector.broadcast %cst_9 : f32 to vector<1x512xf32>
      %c0_10 = arith.constant 0 : index
      %c0_11 = arith.constant 0 : index
      %18 = vector.load %arg8[%c0_10, %c0_11] : memref<1x512xf32, #tpu.memory_space<vmem>>, vector<1x512xf32>
      tpu.vector_store %arg8[%c0_10, %c0_11], %17 {strides = array<i32>} : memref<1x512xf32, #tpu.memory_space<vmem>>, vector<1x512xf32>,
      %cst_12 = arith.constant 0.000000e+00 : f32
      %19 = vector.broadcast %cst_12 : f32 to vector<1x512xf32>
      %c0_13 = arith.constant 0 : index
      %c0_14 = arith.constant 0 : index
      %20 = vector.load %arg9[%c0_13, %c0_14] : memref<1x512xf32, #tpu.memory_space<vmem>>, vector<1x512xf32>
      tpu.vector_store %arg9[%c0_13, %c0_14], %19 {strides = array<i32>} : memref<1x512xf32, #tpu.memory_space<vmem>>, vector<1x512xf32>,
    } else {
    }
    %c1_i32 = arith.constant 1 : i32
    %3 = arith.cmpi slt, %arg0, %c1_i32 : i32
    %4 = arith.extui %3 : i1 to i32
    %c0_i32_1 = arith.constant 0 : i32
    %5 = arith.cmpi ne, %4, %c0_i32_1 : i32
    scf.if %5 {
      %c0 = arith.constant 0 : index
      %c0_8 = arith.constant 0 : index
      %15 = vector.load %arg1[%c0, %c0_8] : memref<8x16xf32, #tpu.memory_space<vmem>>, vector<8x16xf32>
      %c0_9 = arith.constant 0 : index
      %c0_10 = arith.constant 0 : index
      %16 = vector.load %arg2[%c0_9, %c0_10] : memref<8x1xi32, #tpu.memory_space<vmem>>, vector<8x1xi32>
      %c0_11 = arith.constant 0 : index
      %c0_12 = arith.constant 0 : index
      %17 = vector.load %arg3[%c0_11, %c0_12] : memref<1x16xf32, #tpu.memory_space<vmem>>, vector<1x16xf32>
      %18 = tpu.iota {dimensions = array<i32: 1>} : vector<8x16xi32>
      %c8_i32 = arith.constant 8 : i32
      %19 = arith.muli %arg0, %c8_i32 : i32
      %20 = tpu.iota {dimensions = array<i32: 0>} : vector<8x1xi32>
      %21 = vector.broadcast %19 : i32 to vector<8x1xi32>
      %22 = arith.addi %21, %20 : vector<8x1xi32>
      %cst = arith.constant dense<0xFF800000> : vector<8xf32>
      %23 = vector.multi_reduction <maximumf>, %15, %cst [1] : vector<8x16xf32> to vector<8xf32>
      %24 = vector.shape_cast %23 : vector<8xf32> to vector<8x1xf32>
      %25 = vector.broadcast %24 : vector<8x1xf32> to vector<8x16xf32>
      %26 = arith.subf %15, %25 : vector<8x16xf32>
      %27 = math.exp %26 : vector<8x16xf32>
      %cst_13 = arith.constant dense<0.000000e+00> : vector<8xf32>
      %28 = vector.multi_reduction <add>, %27, %cst_13 [1] : vector<8x16xf32> to vector<8xf32>
      %29 = vector.shape_cast %28 : vector<8xf32> to vector<8x1xf32>
      %30 = math.log %29 : vector<8x1xf32>
      %31 = arith.addf %30, %24 : vector<8x1xf32>
      %32 = vector.broadcast %16 : vector<8x1xi32> to vector<8x16xi32>
      %33 = arith.cmpi eq, %18, %32 : vector<8x16xi32>
      %c8_i32_14 = arith.constant 8 : i32
      %34 = vector.broadcast %c8_i32_14 : i32 to vector<8x1xi32>
      %35 = arith.cmpi slt, %22, %34 : vector<8x1xi32>
      %36 = vector.broadcast %35 : vector<8x1xi1> to vector<8x16xi1>
      %37 = arith.andi %33, %36 : vector<8x16xi1>
      %38 = vector.broadcast %31 : vector<8x1xf32> to vector<8x16xf32>
      %39 = arith.subf %38, %15 : vector<8x16xf32>
      %40 = vector.broadcast %17 : vector<1x16xf32> to vector<8x16xf32>
      %41 = arith.mulf %39, %40 : vector<8x16xf32>
      %cst_15 = arith.constant 0.000000e+00 : f32
      %42 = vector.broadcast %cst_15 : f32 to vector<8x16xf32>
      %43 = arith.select %37, %41, %42 : vector<8x16xi1>, vector<8x16xf32>
      %c0_16 = arith.constant 0 : index
      %c0_17 = arith.constant 0 : index
      %44 = vector.load %arg7[%c0_16, %c0_17] : memref<1x16xf32, #tpu.memory_space<vmem>>, vector<1x16xf32>
      %cst_18 = arith.constant dense<0.000000e+00> : vector<16xf32>
      %45 = vector.multi_reduction <add>, %43, %cst_18 [0] : vector<8x16xf32> to vector<16xf32>
      %46 = vector.shape_cast %45 : vector<16xf32> to vector<1x16xf32>
      %47 = arith.addf %44, %46 : vector<1x16xf32>
      %c0_19 = arith.constant 0 : index
      %c0_20 = arith.constant 0 : index
      %48 = vector.load %arg7[%c0_19, %c0_20] : memref<1x16xf32, #tpu.memory_space<vmem>>, vector<1x16xf32>
      tpu.vector_store %arg7[%c0_19, %c0_20], %47 {strides = array<i32>} : memref<1x16xf32, #tpu.memory_space<vmem>>, vector<1x16xf32>,
    } else {
    }
    %c1_i32_2 = arith.constant 1 : i32
    %6 = arith.cmpi slt, %arg0, %c1_i32_2 : i32
    %7 = arith.extui %6 : i1 to i32
    %c0_i32_3 = arith.constant 0 : i32
    %8 = arith.cmpi ne, %7, %c0_i32_3 : i32
    scf.if %8 {
      %c0 = arith.constant 0 : index
      %c0_8 = arith.constant 0 : index
      %15 = vector.load %arg4[%c0, %c0_8] : memref<8x512xf32, #tpu.memory_space<vmem>>, vector<8x512xf32>
      %c8_i32 = arith.constant 8 : i32
      %16 = arith.muli %arg0, %c8_i32 : i32
      %17 = tpu.iota {dimensions = array<i32: 0>} : vector<8x1xi32>
      %18 = vector.broadcast %16 : i32 to vector<8x1xi32>
      %19 = arith.addi %18, %17 : vector<8x1xi32>
      %c4_i32 = arith.constant 4 : i32
      %20 = vector.broadcast %c4_i32 : i32 to vector<8x1xi32>
      %21 = arith.cmpi slt, %19, %20 : vector<8x1xi32>
      %22 = arith.mulf %15, %15 : vector<8x512xf32>
      %cst = arith.constant 0.000000e+00 : f32
      %23 = vector.shape_cast %21 : vector<8x1xi1> to vector<8x1xi1>
      %24 = vector.broadcast %23 : vector<8x1xi1> to vector<8x512xi1>
      %25 = vector.broadcast %cst : f32 to vector<8x512xf32>
      %26 = arith.select %24, %22, %25 : vector<8x512xi1>, vector<8x512xf32>
      %c0_9 = arith.constant 0 : index
      %c0_10 = arith.constant 0 : index
      %27 = vector.load %arg8[%c0_9, %c0_10] : memref<1x512xf32, #tpu.memory_space<vmem>>, vector<1x512xf32>
      %cst_11 = arith.constant dense<0.000000e+00> : vector<512xf32>
      %28 = vector.multi_reduction <add>, %26, %cst_11 [0] : vector<8x512xf32> to vector<512xf32>
      %29 = vector.shape_cast %28 : vector<512xf32> to vector<1x512xf32>
      %30 = arith.addf %27, %29 : vector<1x512xf32>
      %c0_12 = arith.constant 0 : index
      %c0_13 = arith.constant 0 : index
      %31 = vector.load %arg8[%c0_12, %c0_13] : memref<1x512xf32, #tpu.memory_space<vmem>>, vector<1x512xf32>
      tpu.vector_store %arg8[%c0_12, %c0_13], %30 {strides = array<i32>} : memref<1x512xf32, #tpu.memory_space<vmem>>, vector<1x512xf32>,
    } else {
    }
    %c1_i32_4 = arith.constant 1 : i32
    %9 = arith.cmpi slt, %arg0, %c1_i32_4 : i32
    %10 = arith.extui %9 : i1 to i32
    %c0_i32_5 = arith.constant 0 : i32
    %11 = arith.cmpi ne, %10, %c0_i32_5 : i32
    scf.if %11 {
      %c0 = arith.constant 0 : index
      %c0_8 = arith.constant 0 : index
      %15 = vector.load %arg5[%c0, %c0_8] : memref<8x512xf32, #tpu.memory_space<vmem>>, vector<8x512xf32>
      %c8_i32 = arith.constant 8 : i32
      %16 = arith.muli %arg0, %c8_i32 : i32
      %17 = tpu.iota {dimensions = array<i32: 0>} : vector<8x1xi32>
      %18 = vector.broadcast %16 : i32 to vector<8x1xi32>
      %19 = arith.addi %18, %17 : vector<8x1xi32>
      %c4_i32 = arith.constant 4 : i32
      %20 = vector.broadcast %c4_i32 : i32 to vector<8x1xi32>
      %21 = arith.cmpi slt, %19, %20 : vector<8x1xi32>
      %22 = arith.mulf %15, %15 : vector<8x512xf32>
      %cst = arith.constant 0.000000e+00 : f32
      %23 = vector.shape_cast %21 : vector<8x1xi1> to vector<8x1xi1>
      %24 = vector.broadcast %23 : vector<8x1xi1> to vector<8x512xi1>
      %25 = vector.broadcast %cst : f32 to vector<8x512xf32>
      %26 = arith.select %24, %22, %25 : vector<8x512xi1>, vector<8x512xf32>
      %c0_9 = arith.constant 0 : index
      %c0_10 = arith.constant 0 : index
      %27 = vector.load %arg9[%c0_9, %c0_10] : memref<1x512xf32, #tpu.memory_space<vmem>>, vector<1x512xf32>
      %cst_11 = arith.constant dense<0.000000e+00> : vector<512xf32>
      %28 = vector.multi_reduction <add>, %26, %cst_11 [0] : vector<8x512xf32> to vector<512xf32>
      %29 = vector.shape_cast %28 : vector<512xf32> to vector<1x512xf32>
      %30 = arith.addf %27, %29 : vector<1x512xf32>
      %c0_12 = arith.constant 0 : index
      %c0_13 = arith.constant 0 : index
      %31 = vector.load %arg9[%c0_12, %c0_13] : memref<1x512xf32, #tpu.memory_space<vmem>>, vector<1x512xf32>
      tpu.vector_store %arg9[%c0_12, %c0_13], %30 {strides = array<i32>} : memref<1x512xf32, #tpu.memory_space<vmem>>, vector<1x512xf32>,
    } else {
    }
    %c0_i32_6 = arith.constant 0 : i32
    %12 = arith.cmpi eq, %arg0, %c0_i32_6 : i32
    %13 = arith.extui %12 : i1 to i32
    %c0_i32_7 = arith.constant 0 : i32
    %14 = arith.cmpi ne, %13, %c0_i32_7 : i32
    scf.if %14 {
      %c0 = arith.constant 0 : index
      %c0_8 = arith.constant 0 : index
      %15 = vector.load %arg7[%c0, %c0_8] : memref<1x16xf32, #tpu.memory_space<vmem>>, vector<1x16xf32>
      %cst = arith.constant dense<0.000000e+00> : vector<1xf32>
      %16 = vector.multi_reduction <add>, %15, %cst [1] : vector<1x16xf32> to vector<1xf32>
      %17 = vector.shape_cast %16 : vector<1xf32> to vector<1x1xf32>
      %c0_9 = arith.constant 0 : index
      %c0_10 = arith.constant 0 : index
      %18 = vector.load %arg8[%c0_9, %c0_10] : memref<1x512xf32, #tpu.memory_space<vmem>>, vector<1x512xf32>
      %cst_11 = arith.constant dense<0.000000e+00> : vector<1xf32>
      %19 = vector.multi_reduction <add>, %18, %cst_11 [1] : vector<1x512xf32> to vector<1xf32>
      %20 = vector.shape_cast %19 : vector<1xf32> to vector<1x1xf32>
      %c0_12 = arith.constant 0 : index
      %c0_13 = arith.constant 0 : index
      %21 = vector.load %arg9[%c0_12, %c0_13] : memref<1x512xf32, #tpu.memory_space<vmem>>, vector<1x512xf32>
      %cst_14 = arith.constant dense<0.000000e+00> : vector<1xf32>
      %22 = vector.multi_reduction <add>, %21, %cst_14 [1] : vector<1x512xf32> to vector<1xf32>
      %23 = vector.shape_cast %22 : vector<1xf32> to vector<1x1xf32>
      %24 = math.sqrt %20 : vector<1x1xf32>
      %25 = math.sqrt %23 : vector<1x1xf32>
      %26 = arith.addf %24, %25 : vector<1x1xf32>
      %cst_15 = arith.constant 0.00999999977 : f32
      %27 = vector.broadcast %cst_15 : f32 to vector<1x1xf32>
      %28 = arith.mulf %27, %26 : vector<1x1xf32>
      %29 = arith.addf %17, %28 : vector<1x1xf32>
      %cst_16 = arith.constant 1.250000e-01 : f32
      %30 = vector.broadcast %cst_16 : f32 to vector<1x1xf32>
      %31 = arith.mulf %29, %30 : vector<1x1xf32>
      %c0_17 = arith.constant 0 : index
      %c0_18 = arith.constant 0 : index
      %32 = vector.load %arg6[%c0_17, %c0_18] : memref<1x1xf32, #tpu.memory_space<vmem>>, vector<1x1xf32>
      tpu.vector_store %arg6[%c0_17, %c0_18], %31 {strides = array<i32>} : memref<1x1xf32, #tpu.memory_space<vmem>>, vector<1x1xf32>,
    } else {
    }
    return
  }
  func.func @transform_0(%arg0: i32) -> (i32, i32) {
    %c0_i32 = arith.constant 0 : i32
    %0 = arith.minsi %arg0, %c0_i32 : i32
    %c0_i32_0 = arith.constant 0 : i32
    %c0_i32_1 = arith.constant 0 : i32
    return %0, %c0_i32_0 : i32, i32
  }
  func.func @transform_1(%arg0: i32) -> (i32, i32) {
    %c0_i32 = arith.constant 0 : i32
    %0 = arith.minsi %arg0, %c0_i32 : i32
    %c0_i32_0 = arith.constant 0 : i32
    %c0_i32_1 = arith.constant 0 : i32
    return %0, %c0_i32_0 : i32, i32
  }
  func.func @transform_2(%arg0: i32) -> (i32, i32) {
    %c0_i32 = arith.constant 0 : i32
    %c0_i32_0 = arith.constant 0 : i32
    %c0_i32_1 = arith.constant 0 : i32
    return %c0_i32, %c0_i32_0 : i32, i32
  }
  func.func @transform_3(%arg0: i32) -> (i32, i32) {
    %c0_i32 = arith.constant 0 : i32
    %0 = arith.minsi %arg0, %c0_i32 : i32
    %c0_i32_0 = arith.constant 0 : i32
    %c0_i32_1 = arith.constant 0 : i32
    return %0, %c0_i32_0 : i32, i32
  }
  func.func @transform_4(%arg0: i32) -> (i32, i32) {
    %c0_i32 = arith.constant 0 : i32
    %0 = arith.minsi %arg0, %c0_i32 : i32
    %c0_i32_0 = arith.constant 0 : i32
    %c0_i32_1 = arith.constant 0 : i32
    return %0, %c0_i32_0 : i32, i32
  }
  func.func @transform_5(%arg0: i32) -> (i32, i32) {
    %c0_i32 = arith.constant 0 : i32
    %c0_i32_0 = arith.constant 0 : i32
    %c0_i32_1 = arith.constant 0 : i32
    return %c0_i32, %c0_i32_0 : i32, i32
  }
}

</mosaic_0001>

<bundles_post_ra>
// kernel: tpu_custom_call.1
= control target key start
LH: loop header
LB: loop body
LE: loop exit
PB: predicated region body
PF: predicated region fallthrough
CT: control target
= control target key end

     0   :  { %10 = vsyncpa [#allocation6], 0  ;;  %s566_s0 = inlined_call_operand.vmem [shape: f32[8,16], index: 0, kind: input, shape index: {}]   ;;  %s567_s1 = inlined_call_operand.vmem [shape: s32[8,1], index: 1, kind: input, shape index: {}]   ;;  %s568_s2 = inlined_call_operand.vmem [shape: f32[1,16], index: 2, kind: input, shape index: {}]   ;;  %s569_s3 = inlined_call_operand.hbm [shape: f32[4,512], index: 3, kind: input, shape index: {}]   ;;  %s570_s4 = inlined_call_operand.hbm [shape: f32[4,512], index: 4, kind: input, shape index: {}]   ;;  %s571_s5 = inlined_call_operand.hbm [shape: f32[1,1], index: 5, kind: output, shape index: {}]  }
   0x1   :  { %11 = vsyncpa [#allocation9], 0 }
   0x2   :  { %12 = vsyncpa [#allocation7], 0 }
   0x3   :  { %22 = vsyncadd [#allocation6], 256  ;;  %s23_s20 = sshll.u32 %s569_s3, 4  ;;  %s456_s21 = smov [#allocation5]   ;;  %s24_s20 = int_to_ptr.hbm [resolvable:$true] %s23_s20 }
   0x4   :  { %s25_s22 = sshll.u32 %s456_s21, 4  ;;  %s457_s23 = smov 256   ;;  %s26_s22 = int_to_ptr.vmem [resolvable:$true] %s25_s22 }
   0x5   :  { %s458_s24 = smov 16  }
   0x6   :  { %31 = dma.hbm_to_vmem [thread:$0]  %s24_s20, 256, %s26_s22, [#allocation6], %s457_s23, %s457_s23, %s458_s24  }
   0x7   :  { %35 = vsyncadd [#allocation9], 256  ;;  %s36_s27 = sshll.u32 %s570_s4, 4  ;;  %s459_s28 = smov [#allocation8]   ;;  %s37_s27 = int_to_ptr.hbm [resolvable:$true] %s36_s27 }
   0x8   :  { %s38_s29 = sshll.u32 %s459_s28, 4  ;;  %s39_s29 = int_to_ptr.vmem [resolvable:$true] %s38_s29 }
   0x9   :  { %44 = dma.hbm_to_vmem [thread:$0]  %s37_s27, 256, %s39_s29, [#allocation9], %s457_s23, %s457_s23, %s458_s24  }
   0xa   :  { %450 = dma.done.wait [#allocation6], 512  }
   0xb   :  { %451 = vsyncadd [#allocation6], 4294966784 }
   0xc   :  { %452 = dma.done.wait [#allocation9], 512  }
   0xd   :  { %453 = vsyncadd [#allocation9], 4294966784  ;;  %vm79_vm0 = vcmask 130048   ;;  %v502_v0 = vld [vmem:[%s566_s0] sm:$0xff]  ;;  %v59_v3 = vlaneseq  ;;  %v117_v4 = vld [vmem:[#allocation5] sm:$0xff]  ;;  %v460_v6 = vmov 0  }
   0xe   :  { %v80_v1 = vsel %vm79_vm0, %v502_v0, -inf  ;;  %v70_v2 = vld [vmem:[%s567_s1] sm:$0xff]  ;;  %367 = vset.pattern.permute.xlu1 %v460_v6  ;;  %v120_v8 = vld [vmem:[#allocation5 + $0x18] sm:$0xff]  ;;  %v122_v9 = vmul.f32 %v117_v4, %v117_v4  ;;  %368 = vset.pattern.permute.xlu0 %v460_v6  ;;  %v461_v13 = vmov 0.0   ;;  %v196_v15 = vld [vmem:[#allocation8] sm:$0xff]  ;;  %vm183_vm3 = vcmask 1040384  }
   0xf   :  { %81 = vmax.xlane.f32.xlu0 %v80_v1  ;;  %v118_v5 = vld [vmem:[#allocation5 + $0x8] sm:$0xff]  ;;  %v119_v7 = vld [vmem:[#allocation5 + $0x10] sm:$0xff]  ;;  %93 = vperm.xlu1 %367, %v70_v2   ;;  %vm510_vm1 = vcmp.lt.s32.totalorder %v59_v3, 512  ;;  %v125_v14 = vmul.f32 %v120_v8, %v120_v8  ;;  %v200_v18 = vmul.f32 %v196_v15, %v196_v15  ;;  %v199_v19 = vld [vmem:[#allocation8 + $0x18] sm:$0xff]  ;;  %v76_v27 = vshrl.u32 %v59_v3, 7  ;;  %s349_s10 = sshll.u32 %s571_s5, 4  ;;  %s350_s10 = int_to_ptr.hbm [resolvable:$true] %s349_s10 }
  0x10   :  { %v123_v11 = vmul.f32 %v118_v5, %v118_v5  ;;  %v124_v12 = vmul.f32 %v119_v7, %v119_v7  ;;  %64 = vst.msk [vmem:[#allocation4] sm:$0xf] %vm510_vm1, %v461_v13  ;;  %v198_v16 = vld [vmem:[#allocation8 + $0x10] sm:$0xff]  ;;  %v197_v17 = vld [vmem:[#allocation8 + $0x8] sm:$0xff]  ;;  %v203_v24 = vmul.f32 %v199_v19, %v199_v19  ;;  %vm185_vm4 = vcmask 1042434  }
  0x11   :  { %132 = vst [vmem:[#allocation1] ss:$2 sm:$0xff] %v122_v9  ;;  %v202_v20 = vmul.f32 %v198_v16, %v198_v16  ;;  %v201_v23 = vmul.f32 %v197_v17, %v197_v17  ;;  %vm121_vm2 = vcmp.lt.s32.totalorder %v76_v27, 4  ;;  %vm187_vm5 = vcmask 1041408  }
  0x12   :  { %134 = vst [vmem:[#allocation1 + $0x1] ss:$2 sm:$0xff] %v124_v12  ;;  %vm57_vm6 = vcmask 122880   ;;  %vm340_vm12 = vcmask 0  }
  0x13   :  { %136 = vst [vmem:[#allocation1 + $0x10] ss:$2 sm:$0xff] %v123_v11 }
  0x14   :  { %138 = vst [vmem:[#allocation1 + $0x11] ss:$2 sm:$0xff] %v125_v14 }
  0x15   :  { %63 = vst.msk [vmem:[#allocation3] sm:$0xf] %vm510_vm1, %v461_v13 }
  0x16   :  { %58 = vst.msk [vmem:[#allocation2] sm:$0x1] %vm57_vm6, %v461_v13 }
  0x17   :  { %v227_v27 = vld [vmem:[#allocation4] sm:$0xf] }
  0x19   :  { %v139_v21 = vld.sshfl [vmem:[#allocation1] sm:$0xff pattern:$0x75316420]  ;;  %v140_v22 = vld.sshfl [vmem:[#allocation1 + $0x8] sm:$0xff pattern:$0x75316420] }
  0x1a   :  { %208 = vst [vmem:[#allocation1] ss:$2 sm:$0xff] %v200_v18  ;;  %v147_v48 = vsel %vm121_vm2, %v139_v21, 0.0  ;;  %v148_v49 = vsel %vm121_vm2, %v140_v22, 0.0 }
  0x1b   :  { %v141_v25 = vld.sshfl [vmem:[#allocation1 + $0x10] sm:$0xff pattern:$0x75316420]  ;;  %v142_v26 = vld.sshfl [vmem:[#allocation1 + $0x18] sm:$0xff pattern:$0x75316420] }
  0x1c   :  { %210 = vst [vmem:[#allocation1 + $0x1] ss:$2 sm:$0xff] %v202_v20  ;;  %v149_v50 = vsel %vm121_vm2, %v141_v25, 0.0  ;;  %v150_v55 = vsel %vm121_vm2, %v142_v26, 0.0  ;;  %v152_v58 = vrot.slane %v147_v48, 4  ;;  %v158_v59 = vrot.slane %v148_v49, 4 }
  0x1d   :  { %212 = vst [vmem:[#allocation1 + $0x10] ss:$2 sm:$0xff] %v201_v23  ;;  %v164_v63 = vrot.slane %v149_v50, 4  ;;  %v170_v5 = vrot.slane %v150_v55, 4 }
  0x1e   :  { %214 = vst [vmem:[#allocation1 + $0x11] ss:$2 sm:$0xff] %v203_v24  ;;  %v153_v2 = vadd.f32 %v152_v58, %v147_v48  ;;  %v159_v4 = vadd.f32 %v158_v59, %v148_v49 }
  0x1f   :  { %v165_v9 = vadd.f32 %v164_v63, %v149_v50  ;;  %v171_v15 = vadd.f32 %v170_v5, %v150_v55 }
  0x20   :  { %v154_v12 = vrot.slane %v153_v2, 2  ;;  %v160_v14 = vrot.slane %v159_v4, 2 }
  0x21   :  { %v166_v19 = vrot.slane %v165_v9, 2  ;;  %v172_v22 = vrot.slane %v171_v15, 2 }
  0x22   :  { %v155_v20 = vadd.f32 %v154_v12, %v153_v2  ;;  %v161_v21 = vadd.f32 %v160_v14, %v159_v4 }
  0x23   :  { %v215_v31 = vld.sshfl [vmem:[#allocation1] sm:$0xff pattern:$0x75316420]  ;;  %v216_v32 = vld.sshfl [vmem:[#allocation1 + $0x8] sm:$0xff pattern:$0x75316420]  ;;  %v167_v26 = vadd.f32 %v166_v19, %v165_v9 }
  0x24   :  { %v223_v33 = vsel %vm121_vm2, %v215_v31, 0.0  ;;  %v224_v36 = vsel %vm121_vm2, %v216_v32, 0.0  ;;  %v173_v31 = vadd.f32 %v172_v22, %v171_v15 }
  0x25   :  { %v217_v34 = vld.sshfl [vmem:[#allocation1 + $0x10] sm:$0xff pattern:$0x75316420]  ;;  %v218_v35 = vld.sshfl [vmem:[#allocation1 + $0x18] sm:$0xff pattern:$0x75316420] }
  0x26   :  { %v225_v37 = vsel %vm121_vm2, %v217_v34, 0.0  ;;  %v226_v38 = vsel %vm121_vm2, %v218_v35, 0.0  ;;  %v228_v39 = vrot.slane %v223_v33, 4  ;;  %v234_v40 = vrot.slane %v224_v36, 4 }
  0x27   :  { %v240_v41 = vrot.slane %v225_v37, 4  ;;  %v246_v42 = vrot.slane %v226_v38, 4  ;;  %v168_v34 = vrot.slane %v167_v26, 1 }
  0x28   :  { %v229_v43 = vadd.f32 %v228_v39, %v223_v33  ;;  %v235_v44 = vadd.f32 %v234_v40, %v224_v36 }
  0x29   :  { %v241_v45 = vadd.f32 %v240_v41, %v225_v37  ;;  %v247_v46 = vadd.f32 %v246_v42, %v226_v38  ;;  %v174_v38 = vrot.slane %v173_v31, 1  ;;  %v169_v40 = vadd.f32 %v168_v34, %v167_v26 }
  0x2a   :  { %v230_v47 = vrot.slane %v229_v43, 2  ;;  %v236_v52 = vrot.slane %v235_v44, 2 }
  0x2b   :  { %v242_v53 = vrot.slane %v241_v45, 2  ;;  %v248_v54 = vrot.slane %v247_v46, 2  ;;  %v175_v41 = vadd.f32 %v174_v38, %v173_v31 }
  0x2c   :  { %v231_v57 = vadd.f32 %v230_v47, %v229_v43  ;;  %v237_v60 = vadd.f32 %v236_v52, %v235_v44  ;;  %v181_v43 = vrot.slane %v169_v40, 6 }
  0x2d   :  { %v243_v61 = vadd.f32 %v242_v53, %v241_v45  ;;  %v249_v62 = vadd.f32 %v248_v54, %v247_v46  ;;  %v182_v44 = vrot.slane %v175_v41, 5  ;;  %v151_v46 = vld [vmem:[#allocation3] sm:$0xf] }
  0x2e   :  { %v232_v1 = vrot.slane %v231_v57, 1  ;;  %v238_v6 = vrot.slane %v237_v60, 1 }
  0x2f   :  { %v244_v7 = vrot.slane %v243_v61, 1  ;;  %v250_v8 = vrot.slane %v249_v62, 1  ;;  %v186_v47 = vsel %vm185_vm4, %v181_v43, %v182_v44 }
  0x30   :  { %v233_v11 = vadd.f32 %v232_v1, %v231_v57  ;;  %v239_v16 = vadd.f32 %v238_v6, %v237_v60 }
  0x31   :  { %v245_v17 = vadd.f32 %v244_v7, %v243_v61  ;;  %v251_v18 = vadd.f32 %v250_v8, %v249_v62 }
  0x32   :  { %v256_v23 = vrot.slane %v239_v16, 7  ;;  %v73_v16 = vand.u32 127, %v59_v3  ;;  %v106_v3 = vld [vmem:[#allocation2] sm:$0x1] }
  0x33   :  { %v257_v24 = vrot.slane %v245_v17, 6  ;;  %v258_v25 = vrot.slane %v251_v18, 5  ;;  %v369_v18 = vld [vmem:[%s568_s2] ss:$0 sm:$0xff]  ;;  %s462_s2 = smov [#allocation10]  }
  0x34   :  { %v259_v32 = vsel %vm183_vm3, %v233_v11, %v256_v23  ;;  %s347_s7 = sshll.u32 %s462_s2, 4  ;;  %s348_s7 = int_to_ptr.vmem [resolvable:$true] %s347_s7 }
  0x35   :  { %v260_v33 = vsel %vm185_vm4, %v257_v24, %v258_v25 }
  0x36   :  { %v261_v35 = vsel %vm187_vm5, %v259_v32, %v260_v33 }
  0x37   :  { %v263_v39 = vadd.f32 %v261_v35, %v227_v27 }
  0x39   :  { %264 = vst.msk [vmem:[#allocation4] sm:$0xf] %vm510_vm1, %v263_v39 }
  0x40   :  { %v293_v50 = vld [vmem:[#allocation4] sm:$0xf] }
  0x41   :  { %v296_v52 = vperm.slane %v293_v50, 1  ;;  %v297_v53 = vperm.slane %v293_v50, 2  ;;  %v298_v54 = vperm.slane %v293_v50, 3 }
  0x43   :  { %v306_v57 = vsel %vm183_vm3, %v297_v53, 0.0  ;;  %v308_v59 = vsel %vm183_vm3, %v298_v54, 0.0 }
  0x81   :  { %v94_v19 = vpop.permute.xlu1 %93 }
  0x82   :  { %v521_v28 = vpop.xlane.xlu0 %81  ;;  %vm95_vm7 = vcmp.eq.s32.totalorder %v73_v16, %v94_v19 }
  0x83   :  { %v83_v29 = vsub.f32 %v502_v0, %v521_v28 }
  0x85   :  { %v84_v30 = vmul.f32 1.442695, %v83_v29  ;;  %v156_v29 = vrot.slane %v155_v20, 1 }
  0x87   :  { %370 = vpow2.f32 %v84_v30  ;;  %v162_v30 = vrot.slane %v161_v21, 1  ;;  %v157_v36 = vadd.f32 %v156_v29, %v155_v20 }
  0x89   :  { %v163_v37 = vadd.f32 %v162_v30, %v161_v21 }
  0x8b   :  { %v180_v42 = vrot.slane %v163_v37, 7 }
  0x8d   :  { %v371_v51 = vpop.eup %370  ;;  %v184_v45 = vsel %vm183_vm3, %v157_v36, %v180_v42 }
  0x8e   :  { %v86_v56 = vsel %vm79_vm0, %v371_v51, 0.0  ;;  %v188_v48 = vsel %vm187_vm5, %v184_v45, %v186_v47  ;;  %v295_v51 = vperm.slane %v293_v50, 0 }
  0x8f   :  { %87 = vadd.xlane.f32.xlu0 %v86_v56  ;;  %v190_v49 = vadd.f32 %v188_v48, %v151_v46  ;;  %v304_v56 = vsel %vm183_vm3, %v296_v52, 0.0 }
  0x90   :  { %v303_v55 = vsel %vm183_vm3, %v295_v51, 0.0 }
  0x91   :  { %195 = vst.msk [vmem:[#allocation3] sm:$0xf] %vm510_vm1, %v190_v49  ;;  %v305_v58 = vadd.f32 %v304_v56, %v303_v55 }
  0x93   :  { %v307_v60 = vadd.f32 %v306_v57, %v305_v58 }
  0x95   :  { %v309_v62 = vadd.f32 %v308_v59, %v307_v60 }
  0x97   :  { %310 = vadd.xlane.f32.xlu2 %v309_v62 }
  0x98   :  { %v273_v61 = vld [vmem:[#allocation3] sm:$0xf] }
  0x99   :  { %v275_v63 = vperm.slane %v273_v61, 0  ;;  %v276_v1 = vperm.slane %v273_v61, 1  ;;  %v277_v10 = vperm.slane %v273_v61, 2  ;;  %v278_v2 = vperm.slane %v273_v61, 3 }
  0x9b   :  { %v284_v4 = vsel %vm183_vm3, %v275_v63, 0.0  ;;  %v285_v5 = vsel %vm183_vm3, %v276_v1, 0.0  ;;  %v287_v6 = vsel %vm183_vm3, %v277_v10, 0.0  ;;  %v289_v8 = vsel %vm183_vm3, %v278_v2, 0.0 }
  0x9c   :  { %v286_v7 = vadd.f32 %v285_v5, %v284_v4 }
  0x9e   :  { %v288_v9 = vadd.f32 %v287_v6, %v286_v7 }
  0xa0   :  { %v290_v11 = vadd.f32 %v289_v8, %v288_v9 }
  0xa2   :  { %291 = vadd.xlane.f32.xlu1 %v290_v11 }
 0x102   :  { %v88_v12 = vpop.xlane.xlu0 %87 }
 0x103   :  { %372 = vlog2.f32 %v88_v12 }
 0x109   :  { %v373_v14 = vpop.eup %372 }
 0x10a   :  { %v90_v15 = vmul.f32 0.6931472, %v373_v14 }
 0x10c   :  { %v91_v17 = vadd.f32 %v90_v15, %v521_v28 }
 0x10e   :  { %v100_v20 = vsub.f32 %v91_v17, %v502_v0  ;;  %v311_v0 = vpop.xlane.xlu2 %310 }
 0x10f   :  { %374 = vrsqrt.f32 %v311_v0  ;;  %vm331_vm9 = vcmp.eq.f32.partialorder %v311_v0, inf  ;;  %v334_v48 = vand.u32 2147483648, %v311_v0  ;;  %vm333_vm11 = vcmp.eq.f32.partialorder %v311_v0, 0.0 }
 0x110   :  { %v104_v21 = vmul.f32 %v369_v18, %v100_v20 }
 0x112   :  { %v105_v22 = vsel %vm95_vm7, %v104_v21, 0.0 }
 0x113   :  { %v107_v13 = vsel %vm79_vm0, %v105_v22, 0.0 }
 0x114   :  { %v108_v23 = vrot.slane %v107_v13, 4 }
 0x115   :  { %v292_v32 = vpop.xlane.xlu1 %291  ;;  %v375_v33 = vpop.eup %374 }
 0x116   :  { %v109_v24 = vadd.f32 %v108_v23, %v107_v13  ;;  %376 = vrsqrt.f32 %v292_v32  ;;  %v325_v35 = vmul.f32 %v375_v33, %v311_v0  ;;  %vm319_vm8 = vcmp.eq.f32.partialorder %v292_v32, inf }
 0x117   :  { %v322_v47 = vand.u32 2147483648, %v292_v32  ;;  %vm321_vm10 = vcmp.eq.f32.partialorder %v292_v32, 0.0 }
 0x118   :  { %v110_v25 = vrot.slane %v109_v24, 2  ;;  %v326_v38 = vmul.f32 %v375_v33, %v325_v35 }
 0x11a   :  { %v111_v26 = vadd.f32 %v110_v25, %v109_v24  ;;  %v327_v40 = vmul.f32 0.5, %v326_v38 }
 0x11c   :  { %v112_v27 = vrot.slane %v111_v26, 1  ;;  %v377_v34 = vpop.eup %376  ;;  %v328_v42 = vsub.f32 1.5, %v327_v40 }
 0x11d   :  { %v313_v36 = vmul.f32 %v377_v34, %v292_v32 }
 0x11e   :  { %v113_v29 = vadd.f32 %v112_v27, %v111_v26  ;;  %v329_v44 = vmul.f32 %v375_v33, %v328_v42 }
 0x11f   :  { %v314_v37 = vmul.f32 %v377_v34, %v313_v36 }
 0x120   :  { %v114_v28 = vadd.f32 %v113_v29, %v106_v3  ;;  %v330_v46 = vmul.f32 %v329_v44, %v311_v0 }
 0x121   :  { %v315_v39 = vmul.f32 0.5, %v314_v37 }
 0x122   :  { %116 = vst.msk [vmem:[#allocation2] sm:$0x1] %vm57_vm6, %v114_v28  ;;  %v332_v50 = vsel %vm331_vm9, %v311_v0, %v330_v46 }
 0x123   :  { %v316_v41 = vsub.f32 1.5, %v315_v39  ;;  %v335_v52 = vsel %vm333_vm11, %v334_v48, %v332_v50 }
 0x125   :  { %v317_v43 = vmul.f32 %v377_v34, %v316_v41 }
 0x127   :  { %v318_v45 = vmul.f32 %v317_v43, %v292_v32 }
 0x129   :  { %v268_v30 = vld [vmem:[#allocation2] sm:$0x1]  ;;  %v320_v49 = vsel %vm319_vm8, %v292_v32, %v318_v45 }
 0x12a   :  { %v270_v31 = vsel %vm57_vm6, %v268_v30, 0.0  ;;  %v323_v51 = vsel %vm321_vm10, %v322_v47, %v320_v49 }
 0x12b   :  { %271 = vadd.xlane.f32.xlu2 %v270_v31  ;;  %v336_v53 = vadd.f32 %v335_v52, %v323_v51 }
 0x12d   :  { %v337_v54 = vmul.f32 0.01, %v336_v53 }
 0x19e   :  { %v272_v55 = vpop.xlane.xlu2 %271 }
 0x19f   :  { %v338_v56 = vadd.f32 %v337_v54, %v272_v55 }
 0x1a1   :  { %v339_v57 = vmul.f32 0.125, %v338_v56 }
 0x1a3   :  { %341 = vst.msk [vmem:[#allocation10] sm:$0x1] %vm340_vm12, %v339_v57 }
 0x1a4   :  { %352 = dma.vmem_to_hbm [thread:$0]  %s348_s7, 16, %s350_s10, [#allocation7]  }
 0x1a5   :  { %454 = dma.done.wait [#allocation7], 16  }
 0x1a6   :  { %455 = vsyncadd [#allocation7], 4294967280 }
 0x1a7   :  { %357 = vsyncpa [#allocation6], 1 }
 0x1a8   :  { %358 = vsyncpa [#allocation9], 1 }
 0x1a9   :  { %359 = vsyncpa [#allocation7], 1 }

</bundles_post_ra>
